<compile_context>
chip_gen: v6e
topology: v6e:2x2x1
jax: 0.10.0
libtpu: 0.0.40
codegen_flags: <defaults>
</compile_context>

<pallas_src>
import jax
import jax.numpy as jnp
from jax.experimental import pallas as pl
from jax.experimental.pallas import tpu as pltpu


def _round_up(x: int, m: int) -> int:
    return ((x + m - 1) // m) * m


def _physical_vmem_bytes() -> int:
    """Per-TensorCore physical VMEM; conservative 64 MiB (v7x) fallback."""
    try:
        info = pltpu.get_tpu_info()
        v = getattr(info, "vmem_capacity_bytes", None)
        if v:
            return int(v)
    except Exception:
        pass
    return 64 << 20


def _num_tensorcores() -> int:
    """Best-effort TensorCore count of the local device (v7x has 2)."""
    try:
        d = jax.devices()[0]
        n = getattr(d, "num_cores", None)
        if n:
            return int(n)
        kind = str(getattr(d, "device_kind", "")).lower()
        if "v7" in kind:
            return 2
    except Exception:
        pass
    return 1


def _pick_tiling(B, n, dc, dt, w_out, ctx_dtype, tgt_dtype, out_dtype):
    """Pick batch rows per block + vmem limit from *padded* VMEM footprints."""
    # Padded bytes per batch row, per buffer (lanes round up to 128).
    ctx_row = _round_up(n * dc, 128) * jnp.dtype(ctx_dtype).itemsize
    meta_row = _round_up(n + 1, 128) * 4                      # f32 row meta
    tgt_row = _round_up(dt, 128) * jnp.dtype(tgt_dtype).itemsize
    out_row = w_out * jnp.dtype(out_dtype).itemsize           # already 128-aligned
    per_row = 2 * (ctx_row + meta_row + tgt_row + out_row)    # double-buffered

    phys = _physical_vmem_bytes()
    # Keep total resident blocks well under physical VMEM so double-buffering
    # survives on v7x (64 MiB/TC) and there is headroom on v5e/v6e (128 MiB).
    resident_budget = min(phys * 5 // 8, 48 << 20)

    # Sublane packing of the batch axis: 8 rows (4B dtypes), 16 (2B), 32 (1B).
    align = 8
    for d in (ctx_dtype, tgt_dtype, out_dtype):
        align = max(align, 32 // max(1, jnp.dtype(d).itemsize))

    rows = max(align, resident_budget // per_row)
    tb = max(align, (rows // align) * align)
    tb = min(tb, 2048)                       # per-step overhead already amortized
    tb = min(tb, _round_up(B, align))

    n_tc = _num_tensorcores()
    if n_tc > 1 and B >= n_tc * align:
        # Keep >= n_tc grid steps so dimension_semantics=("parallel",) can
        # shard the batch axis across both v7x TensorCores.
        tb = min(tb, max(align, ((B // n_tc) // align) * align))

    vmem_limit = min(phys, max(resident_budget + (16 << 20),
                               per_row * tb + (4 << 20)))
    return int(tb), int(vmem_limit)


def _agg_kernel(ctx_ref, meta_ref, tgt_ref, out_ref):
    # ctx_ref : (TB, N*Dc)  lane-dense folded context encodings (native dtype)
    # meta_ref: (TB, N+1)   f32: [:, :N] = mask, [:, N] = 1/max(sum(mask), 1)
    # tgt_ref : (TB, Dt)    target-agent encoding
    # out_ref : (TB, Wout)  Wout = roundup(Dt+Dc, 128): [target | pooled | 0pad]
    tb = ctx_ref.shape[0]
    n = meta_ref.shape[1] - 1
    dc = ctx_ref.shape[1] // n
    dt = tgt_ref.shape[1]

    ctx = ctx_ref[...]                         # (TB, N*Dc)
    meta = meta_ref[...]                       # (TB, N+1) f32
    mask = meta[:, :n]                         # (TB, N)  arbitrary / soft mask
    inv_denom = meta[:, n:n + 1]               # (TB, 1)  exact, precomputed

    # Masked sum over the N context elements: short static unroll over dense
    # Dc-wide lane slices; multiply on the VPU, accumulate in f32.
    acc = jnp.zeros((tb, dc), jnp.float32)
    for k in range(n):                         # N is small for this module
        sl = ctx[:, k * dc:(k + 1) * dc].astype(jnp.float32)
        acc = acc + sl * mask[:, k:k + 1]
    pooled = acc * inv_denom                   # (TB, Dc) masked mean

    # Fused, lane-aligned output row: one in-register concat, one full-width
    # unmasked store (no vst.msk partial stores, no lane-shifted sub-stores).
    pieces = [tgt_ref[...].astype(out_ref.dtype), pooled.astype(out_ref.dtype)]
    lane_pad = out_ref.shape[1] - (dt + dc)
    if lane_pad > 0:
        pieces.append(jnp.zeros((tb, lane_pad), out_ref.dtype))
    out_ref[...] = jnp.concatenate(pieces, axis=-1)


def aggregate_context(
    context_encoding: jax.Array,      # (B, N, Dc)
    context_mask: jax.Array,          # (B, N, 1) or (B, N)  0/1 (or soft) mask
    target_encoding: jax.Array,       # (B, Dt)
    *,
    block_rows: int | None = None,
) -> jax.Array:
    """Fused [target | masked-mean_N(context)] -> (B, Dt + Dc)."""
    B, N, Dc = context_encoding.shape
    Bt, Dt = target_encoding.shape
    assert Bt == B
    D_out = Dt + Dc
    w_out = _round_up(D_out, 128)
    out_dtype = jnp.promote_types(target_encoding.dtype, context_encoding.dtype)

    # Lane-dense context stream: fold (N, Dc) into one lane axis (free reshape).
    ctx2d = context_encoding.reshape(B, N * Dc)

    # Tiny per-row metadata stream: the mask plus an exact reciprocal of the
    # valid count (clamped at 1) -> no in-kernel divide / int->float cast.
    mask2d = context_mask.reshape(B, N).astype(jnp.float32)
    inv_denom = 1.0 / jnp.maximum(jnp.sum(mask2d, axis=1, keepdims=True), 1.0)
    meta = jnp.concatenate([mask2d, inv_denom], axis=1)            # (B, N+1) f32

    tb_auto, vmem_limit = _pick_tiling(B, N, Dc, Dt, w_out,
                                       context_encoding.dtype,
                                       target_encoding.dtype, out_dtype)
    tb = block_rows if block_rows is not None else tb_auto

    # Pad B to a multiple of tb (padded rows: zero mask -> pooled = 0).
    Bp = pl.cdiv(B, tb) * tb
    if Bp != B:
        pad = Bp - B
        ctx2d = jnp.pad(ctx2d, ((0, pad), (0, 0)))
        meta = jnp.pad(meta, ((0, pad), (0, 0)))
        target_encoding = jnp.pad(target_encoding, ((0, pad), (0, 0)))

    out_padded = pl.pallas_call(
        _agg_kernel,
        out_shape=jax.ShapeDtypeStruct((Bp, w_out), out_dtype),
        grid_spec=pltpu.PrefetchScalarGridSpec(
            num_scalar_prefetch=0,
            grid=(Bp // tb,),
            in_specs=[
                pl.BlockSpec((tb, N * Dc), lambda b: (b, 0)),
                pl.BlockSpec((tb, N + 1), lambda b: (b, 0)),
                pl.BlockSpec((tb, Dt), lambda b: (b, 0)),
            ],
            out_specs=pl.BlockSpec((tb, w_out), lambda b: (b, 0)),
        ),
        compiler_params=pltpu.CompilerParams(
            dimension_semantics=("parallel",),
            vmem_limit_bytes=vmem_limit,
        ),
    )(ctx2d, meta, target_encoding)

    if Bp == B and w_out == D_out:
        return out_padded
    return out_padded[:B, :D_out]


def prediction_aggregator_forward(encodings: dict) -> jax.Array:
    """
    JAX/Pallas equivalent of a concrete PredictionAggregator.forward:
      agg_encoding = concat(target_agent_encoding,
                            masked_mean_N(context_encoding), axis=-1)
    """
    target = encodings["target_agent_encoding"]               # (B, Dt)
    ctx = encodings["context_encoding"]["combined"]           # (B, N, Dc)
    mask = encodings["context_encoding"]["combined_mask"]     # (B, N, 1) / (B, N)
    return aggregate_context(ctx, mask, target)               # (B, Dt + Dc)


if __name__ == "__main__":
    key = jax.random.PRNGKey(0)

    def reference(ctx, mask, tgt):
        m = mask.reshape(ctx.shape[0], ctx.shape[1], 1).astype(jnp.float32)
        pooled = jnp.sum(ctx * m, axis=1) / jnp.maximum(jnp.sum(m, axis=1), 1.0)
        return jnp.concatenate([tgt, pooled.astype(tgt.dtype)], axis=-1)

    # Config 1: original module-sized shapes; Dt+Dc = 64 exercises the
    # lane-padded output + wrapper-slice path, and includes all-invalid rows.
    B, N, Dt, Dc = 16, 8, 32, 32
    k1, k2 = jax.random.split(key)
    tgt1 = jax.random.normal(k1, (B, Dt), jnp.float32)
    ctx1 = jax.random.normal(k2, (B, N, Dc), jnp.float32)
    counts = (jnp.arange(B, dtype=jnp.int32) * 3) % (N + 1)            # 0..N valid
    mask1 = (jnp.arange(N)[None, :] < counts[:, None]).astype(jnp.float32)[..., None]

    out1 = jax.block_until_ready(prediction_aggregator_forward({
        "target_agent_encoding": tgt1,
        "context_encoding": {"combined": ctx1, "combined_mask": mask1},
    }))
    ref1 = reference(ctx1, mask1, tgt1)
    assert out1.shape == (B, Dt + Dc), out1.shape
    assert jnp.allclose(out1, ref1, atol=1e-5, rtol=1e-5), float(
        jnp.max(jnp.abs(out1 - ref1)))

    # Config 2: scattered (non-prefix) mask, 128-aligned output width (no slice
    # path), and N*Dc not a multiple of 128.
    B2, N2, Dt2, Dc2 = 24, 5, 64, 64
    k3, k4 = jax.random.split(k1)
    tgt2 = jax.random.normal(k3, (B2, Dt2), jnp.float32)
    ctx2 = jax.random.normal(k4, (B2, N2, Dc2), jnp.float32)
    mask2 = (((jnp.arange(B2)[:, None] + jnp.arange(N2)[None, :]) % 3) != 0)
    mask2 = mask2.at[0].set(False).astype(jnp.float32)                 # empty row

    out2 = jax.block_until_ready(prediction_aggregator_forward({
        "target_agent_encoding": tgt2,
        "context_encoding": {"combined": ctx2, "combined_mask": mask2},
    }))
    ref2 = reference(ctx2, mask2, tgt2)
    assert out2.shape == (B2, Dt2 + Dc2), out2.shape
    assert jnp.allclose(out2, ref2, atol=1e-5, rtol=1e-5), float(
        jnp.max(jnp.abs(out2 - ref2)))

    print("KERNEL_OK")
</pallas_src>

<mosaic_0001>
module attributes {stable_mosaic.version = 11 : i64} {
  func.func @_agg_kernel(%arg0: i32, %arg1: memref<16x256xf32, #tpu.memory_space<vmem>>, %arg2: memref<16x9xf32, #tpu.memory_space<vmem>>, %arg3: memref<16x32xf32, #tpu.memory_space<vmem>>, %arg4: memref<16x128xf32, #tpu.memory_space<vmem>>) attributes {dimension_semantics = [#tpu.dimension_semantics<parallel>], iteration_bounds = array<i64: 1>, scalar_prefetch = 0 : i64, scratch_operands = 0 : i64, tpu.core_type = #tpu.core_type<tc>, window_params = [{transform_indices = @transform_0, window_bounds = array<i64: 16, 256>}, {transform_indices = @transform_1, window_bounds = array<i64: 16, 9>}, {transform_indices = @transform_2, window_bounds = array<i64: 16, 32>}, {transform_indices = @transform_3, window_bounds = array<i64: 16, 128>}]} {
    %c0 = arith.constant 0 : index
    %c0_0 = arith.constant 0 : index
    %0 = vector.load %arg1[%c0, %c0_0] : memref<16x256xf32, #tpu.memory_space<vmem>>, vector<16x256xf32>
    %c0_1 = arith.constant 0 : index
    %c0_2 = arith.constant 0 : index
    %1 = vector.load %arg2[%c0_1, %c0_2] : memref<16x9xf32, #tpu.memory_space<vmem>>, vector<16x9xf32>
    %2 = vector.extract_strided_slice %1 {offsets = [0, 0], sizes = [16, 8], strides = [1, 1]} : vector<16x9xf32> to vector<16x8xf32>
    %3 = vector.extract_strided_slice %1 {offsets = [0, 8], sizes = [16, 1], strides = [1, 1]} : vector<16x9xf32> to vector<16x1xf32>
    %cst = arith.constant 0.000000e+00 : f32
    %4 = vector.broadcast %cst : f32 to vector<16x32xf32>
    %5 = vector.extract_strided_slice %0 {offsets = [0, 0], sizes = [16, 32], strides = [1, 1]} : vector<16x256xf32> to vector<16x32xf32>
    %6 = vector.extract_strided_slice %2 {offsets = [0, 0], sizes = [16, 1], strides = [1, 1]} : vector<16x8xf32> to vector<16x1xf32>
    %7 = vector.broadcast %6 : vector<16x1xf32> to vector<16x32xf32>
    %8 = arith.mulf %5, %7 : vector<16x32xf32>
    %9 = arith.addf %4, %8 : vector<16x32xf32>
    %10 = vector.extract_strided_slice %0 {offsets = [0, 32], sizes = [16, 32], strides = [1, 1]} : vector<16x256xf32> to vector<16x32xf32>
    %11 = vector.extract_strided_slice %2 {offsets = [0, 1], sizes = [16, 1], strides = [1, 1]} : vector<16x8xf32> to vector<16x1xf32>
    %12 = vector.broadcast %11 : vector<16x1xf32> to vector<16x32xf32>
    %13 = arith.mulf %10, %12 : vector<16x32xf32>
    %14 = arith.addf %9, %13 : vector<16x32xf32>
    %15 = vector.extract_strided_slice %0 {offsets = [0, 64], sizes = [16, 32], strides = [1, 1]} : vector<16x256xf32> to vector<16x32xf32>
    %16 = vector.extract_strided_slice %2 {offsets = [0, 2], sizes = [16, 1], strides = [1, 1]} : vector<16x8xf32> to vector<16x1xf32>
    %17 = vector.broadcast %16 : vector<16x1xf32> to vector<16x32xf32>
    %18 = arith.mulf %15, %17 : vector<16x32xf32>
    %19 = arith.addf %14, %18 : vector<16x32xf32>
    %20 = vector.extract_strided_slice %0 {offsets = [0, 96], sizes = [16, 32], strides = [1, 1]} : vector<16x256xf32> to vector<16x32xf32>
    %21 = vector.extract_strided_slice %2 {offsets = [0, 3], sizes = [16, 1], strides = [1, 1]} : vector<16x8xf32> to vector<16x1xf32>
    %22 = vector.broadcast %21 : vector<16x1xf32> to vector<16x32xf32>
    %23 = arith.mulf %20, %22 : vector<16x32xf32>
    %24 = arith.addf %19, %23 : vector<16x32xf32>
    %25 = vector.extract_strided_slice %0 {offsets = [0, 128], sizes = [16, 32], strides = [1, 1]} : vector<16x256xf32> to vector<16x32xf32>
    %26 = vector.extract_strided_slice %2 {offsets = [0, 4], sizes = [16, 1], strides = [1, 1]} : vector<16x8xf32> to vector<16x1xf32>
    %27 = vector.broadcast %26 : vector<16x1xf32> to vector<16x32xf32>
    %28 = arith.mulf %25, %27 : vector<16x32xf32>
    %29 = arith.addf %24, %28 : vector<16x32xf32>
    %30 = vector.extract_strided_slice %0 {offsets = [0, 160], sizes = [16, 32], strides = [1, 1]} : vector<16x256xf32> to vector<16x32xf32>
    %31 = vector.extract_strided_slice %2 {offsets = [0, 5], sizes = [16, 1], strides = [1, 1]} : vector<16x8xf32> to vector<16x1xf32>
    %32 = vector.broadcast %31 : vector<16x1xf32> to vector<16x32xf32>
    %33 = arith.mulf %30, %32 : vector<16x32xf32>
    %34 = arith.addf %29, %33 : vector<16x32xf32>
    %35 = vector.extract_strided_slice %0 {offsets = [0, 192], sizes = [16, 32], strides = [1, 1]} : vector<16x256xf32> to vector<16x32xf32>
    %36 = vector.extract_strided_slice %2 {offsets = [0, 6], sizes = [16, 1], strides = [1, 1]} : vector<16x8xf32> to vector<16x1xf32>
    %37 = vector.broadcast %36 : vector<16x1xf32> to vector<16x32xf32>
    %38 = arith.mulf %35, %37 : vector<16x32xf32>
    %39 = arith.addf %34, %38 : vector<16x32xf32>
    %40 = vector.extract_strided_slice %0 {offsets = [0, 224], sizes = [16, 32], strides = [1, 1]} : vector<16x256xf32> to vector<16x32xf32>
    %41 = vector.extract_strided_slice %2 {offsets = [0, 7], sizes = [16, 1], strides = [1, 1]} : vector<16x8xf32> to vector<16x1xf32>
    %42 = vector.broadcast %41 : vector<16x1xf32> to vector<16x32xf32>
    %43 = arith.mulf %40, %42 : vector<16x32xf32>
    %44 = arith.addf %39, %43 : vector<16x32xf32>
    %45 = vector.broadcast %3 : vector<16x1xf32> to vector<16x32xf32>
    %46 = arith.mulf %44, %45 : vector<16x32xf32>
    %c0_3 = arith.constant 0 : index
    %c0_4 = arith.constant 0 : index
    %47 = vector.load %arg3[%c0_3, %c0_4] : memref<16x32xf32, #tpu.memory_space<vmem>>, vector<16x32xf32>
    %cst_5 = arith.constant 0.000000e+00 : f32
    %48 = vector.broadcast %cst_5 : f32 to vector<16x64xf32>
    %49 = tpu.concatenate %47, %46, %48 in 1 : vector<16x32xf32>, vector<16x32xf32>, vector<16x64xf32> -> vector<16x128xf32>
    %c0_6 = arith.constant 0 : index
    %c0_7 = arith.constant 0 : index
    %50 = vector.load %arg4[%c0_6, %c0_7] : memref<16x128xf32, #tpu.memory_space<vmem>>, vector<16x128xf32>
    tpu.vector_store %arg4[%c0_6, %c0_7], %49 {strides = array<i32>} : memref<16x128xf32, #tpu.memory_space<vmem>>, vector<16x128xf32>,
    return
  }
  func.func @transform_0(%arg0: i32) -> (i32, i32) {
    %c0_i32 = arith.constant 0 : i32
    %c0_i32_0 = arith.constant 0 : i32
    return %arg0, %c0_i32 : i32, i32
  }
  func.func @transform_1(%arg0: i32) -> (i32, i32) {
    %c0_i32 = arith.constant 0 : i32
    %c0_i32_0 = arith.constant 0 : i32
    return %arg0, %c0_i32 : i32, i32
  }
  func.func @transform_2(%arg0: i32) -> (i32, i32) {
    %c0_i32 = arith.constant 0 : i32
    %c0_i32_0 = arith.constant 0 : i32
    return %arg0, %c0_i32 : i32, i32
  }
  func.func @transform_3(%arg0: i32) -> (i32, i32) {
    %c0_i32 = arith.constant 0 : i32
    %c0_i32_0 = arith.constant 0 : i32
    return %arg0, %c0_i32 : i32, i32
  }
}

</mosaic_0001>

<bundles_post_ra>
// kernel: tpu_custom_call.1
= control target key start
LH: loop header
LB: loop body
LE: loop exit
PB: predicated region body
PF: predicated region fallthrough
CT: control target
= control target key end

     0   :  { %8 = vsyncpa [#allocation3], 0  ;;  %s441_s0 = inlined_call_operand.hbm [shape: f32[16,256], index: 0, kind: input, shape index: {}]   ;;  %s442_s1 = inlined_call_operand.hbm [shape: f32[16,9], index: 1, kind: input, shape index: {}]   ;;  %s443_s2 = inlined_call_operand.hbm [shape: f32[16,32], index: 2, kind: input, shape index: {}]   ;;  %s444_s3 = inlined_call_operand.hbm [shape: f32[16,128], index: 3, kind: output, shape index: {}]  }
   0x1   :  { %9 = vsyncpa [#allocation6], 0 }
   0x2   :  { %10 = vsyncpa [#allocation4], 0  ;;  %s374_s12 = smov [#allocation5]  }
   0x3   :  { %s28_s13 = sshll.u32 %s374_s12, 4  ;;  %s29_s13 = int_to_ptr.vmem [resolvable:$true] %s28_s13 }
   0x4   :  { %s296_s14 = scalar_lea.vmem %s29_s13, 256  ;;  %p301_p1 = scmp.lt.s32.totalorder %s29_s13, %s29_s13 }
   0x5   :  { %p297_p0 = scmp.ne.s32.totalorder %s29_s13, %s296_s14  ;;  %p302_p2 = scmp.lt.s32.totalorder %s296_s14, %s296_s14 }
   0x7   :  { %p303_p3 = por %p302_p2, %p301_p1 }
   0x9   :  { %p304_p4 = pnand %p303_p3, %p297_p0 }
   0xb   :  { %307 = shalt.err (!%p304_p4)
}
   0xc   :  { %s375_s15 = smov 128   ;;  %s376_s16 = smov 8  }
   0xd   :  { %34 = dma.hbm_to_vmem [thread:$0]  %s442_s1, 256, %s29_s13, [#allocation6], %s375_s15, %s375_s15, %s376_s16  }
   0xe   :  { %s377_s19 = smov [#allocation2]  }
   0xf   :  { %s16_s20 = sshll.u32 %s377_s19, 4  ;;  %s17_s20 = int_to_ptr.vmem [resolvable:$true] %s16_s20 }
  0x10   :  { %s316_s21 = scalar_lea.vmem %s17_s20, 512  ;;  %p321_p6 = scmp.lt.s32.totalorder %s17_s20, %s17_s20 }
  0x11   :  { %p317_p5 = scmp.ne.s32.totalorder %s17_s20, %s316_s21  ;;  %p322_p7 = scmp.lt.s32.totalorder %s316_s21, %s316_s21 }
  0x13   :  { %p323_p8 = por %p322_p7, %p321_p6 }
  0x15   :  { %p324_p9 = pnand %p323_p8, %p317_p5 }
  0x17   :  { %327 = shalt.err (!%p324_p9)
}
  0x18   :  { %s378_s22 = smov 256   ;;  %s379_s23 = smov 16  }
  0x19   :  { %22 = dma.hbm_to_vmem [thread:$0]  %s441_s0, 512, %s17_s20, [#allocation3], %s378_s22, %s378_s22, %s379_s23  }
  0x1a   :  { %s380_s26 = smov [#allocation7]  }
  0x1b   :  { %s40_s27 = sshll.u32 %s380_s26, 4  ;;  %s41_s27 = int_to_ptr.vmem [resolvable:$true] %s40_s27 }
  0x1c   :  { %s336_s1 = scalar_lea.vmem %s41_s27, 256  ;;  %p341_p11 = scmp.lt.s32.totalorder %s41_s27, %s41_s27 }
  0x1d   :  { %p337_p10 = scmp.ne.s32.totalorder %s41_s27, %s336_s1  ;;  %p342_p12 = scmp.lt.s32.totalorder %s336_s1, %s336_s1 }
  0x1f   :  { %p343_p13 = por %p342_p12, %p341_p11 }
  0x21   :  { %p344_p0 = pnand %p343_p13, %p337_p10 }
  0x23   :  { %347 = shalt.err (!%p344_p0)
}
  0x24   :  { %46 = dma.hbm_to_vmem [thread:$0]  %s443_s2, 256, %s41_s27, [#allocation6], %s375_s15, %s375_s15, %s376_s16  }
  0x25   :  { %368 = dma.done.wait [#allocation3], 512  }
  0x26   :  { %369 = vsyncadd [#allocation3], 4294966784 }
  0x27   :  { %370 = dma.done.wait [#allocation6], 512  }
  0x28   :  { %371 = vsyncadd [#allocation6], 4294966784  ;;  %v381_v0 = vmov 2   ;;  %v382_v1 = vmov 1   ;;  %v60_v2 = vld [vmem:[#allocation5] sm:$0xff]  ;;  %v61_v3 = vld [vmem:[#allocation5 + $0x8] sm:$0xff] }
  0x29   :  { %275 = vset.pattern.permute.xlu1 %v381_v0  ;;  %274 = vset.pattern.permute.xlu0 %v382_v1  ;;  %v383_v4 = vmov 3   ;;  %v384_v5 = vmov 5   ;;  %v385_v6 = vmov 6   ;;  %v386_v7 = vmov 7   ;;  %v56_v11 = vld [vmem:[#allocation2] sm:$0xff]  ;;  %v58_v15 = vld [vmem:[#allocation2 + $0x10] sm:$0xff] }
  0x2a   :  { %97 = vperm.xlu1 %275, %v60_v2   ;;  %77 = vperm.xlu0 %274, %v60_v2   ;;  %v387_v8 = vmov 0   ;;  %v388_v9 = vmov 8   ;;  %v389_v10 = vmov 4   ;;  %s390_s0 = smov 96   ;;  %s391_s2 = smov 64   ;;  %v57_v24 = vld [vmem:[#allocation2 + $0x8] sm:$0xff] }
  0x2b   :  { %s392_s30 = smov 32   ;;  %v59_v25 = vld [vmem:[#allocation2 + $0x18] sm:$0xff]  ;;  %vm228_vm0 = vcmask 261120   ;;  %vm231_vm1 = vcmask 523264   ;;  %s393_s4 = smov [#allocation8]  }
  0x2c   :  { %s241_s5 = sshll.u32 %s393_s4, 4  ;;  %s242_s5 = int_to_ptr.vmem [resolvable:$true] %s241_s5 }
  0x2d   :  { %s348_s6 = scalar_lea.vmem %s242_s5, 256  ;;  %p353_p2 = scmp.lt.s32.totalorder %s242_s5, %s242_s5 }
  0x2e   :  { %101 = vperm.xlu1 %275, %v61_v3   ;;  %81 = vperm.xlu0 %274, %v61_v3   ;;  %p349_p1 = scmp.ne.s32.totalorder %s242_s5, %s348_s6  ;;  %p354_p3 = scmp.lt.s32.totalorder %s348_s6, %s348_s6 }
  0x30   :  { %p355_p4 = por %p354_p3, %p353_p2 }
  0x32   :  { %277 = vset.pattern.permute.xlu1 %v383_v4  ;;  %276 = vset.pattern.permute.xlu0 %v383_v4  ;;  %p356_p5 = pnand %p355_p4, %p349_p1 }
  0x33   :  { %121 = vperm.xlu1 %277, %v61_v3   ;;  %117 = vperm.xlu0 %276, %v60_v2  }
  0x37   :  { %278 = vset.pattern.permute.xlu1 %v384_v5  ;;  %279 = vset.pattern.permute.xlu0 %v384_v5 }
  0x38   :  { %149 = vperm.xlu1 %278, %v60_v2   ;;  %153 = vperm.xlu0 %279, %v61_v3  }
  0x3c   :  { %280 = vset.pattern.permute.xlu1 %v385_v6  ;;  %281 = vset.pattern.permute.xlu0 %v386_v7 }
  0x3d   :  { %169 = vperm.xlu1 %280, %v60_v2   ;;  %189 = vperm.xlu0 %281, %v60_v2  }
  0x41   :  { %173 = vperm.xlu1 %280, %v61_v3   ;;  %284 = vset.pattern.permute.xlu0 %v387_v8 }
  0x42   :  { %69 = vperm.xlu0 %284, %v61_v3  }
  0x45   :  { %282 = vset.pattern.permute.xlu1 %v386_v7 }
  0x46   :  { %193 = vperm.xlu1 %282, %v61_v3   ;;  %286 = vset.pattern.permute.xlu0 %v388_v9 }
  0x47   :  { %209 = vperm.xlu0 %286, %v60_v2  }
  0x4a   :  { %283 = vset.pattern.permute.xlu1 %v387_v8 }
  0x4b   :  { %64 = vperm.xlu1 %283, %v60_v2  }
  0x4f   :  { %285 = vset.pattern.permute.xlu1 %v389_v10 }
  0x50   :  { %137 = vperm.xlu1 %285, %v60_v2  }
  0x54   :  { %141 = vperm.xlu1 %285, %v61_v3  }
  0x58   :  { %287 = vset.pattern.permute.xlu1 %v388_v9 }
  0x59   :  { %213 = vperm.xlu1 %287, %v61_v3  }
  0xa5   :  { %v98_v12 = vpop.permute.xlu1 %97  ;;  %v78_v13 = vpop.permute.xlu0 %77 }
  0xa6   :  { %v84_v14 = vmul.f32 %v78_v13, %v56_v11  ;;  %v104_v18 = vmul.f32 %v98_v12, %v56_v11  ;;  %v218_v13 = vld [vmem:[#allocation7] sm:$0xff] }
  0xa8   :  { %88 = vrot.lane.b32.xlu0 %v84_v14, %s390_s0 }
  0xa9   :  { %v102_v16 = vpop.permute.xlu1 %101  ;;  %v82_v17 = vpop.permute.xlu0 %81 }
  0xaa   :  { %v85_v19 = vmul.f32 %v82_v17, %v58_v15  ;;  %v105_v20 = vmul.f32 %v102_v16, %v58_v15  ;;  %v219_v17 = vld [vmem:[#allocation7 + $0x8] sm:$0xff] }
  0xac   :  { %90 = vrot.lane.b32.xlu1 %v85_v19, %s390_s0  ;;  %108 = vrot.lane.b32.xlu0 %v104_v18, %s391_s2 }
  0xae   :  { %v122_v21 = vpop.permute.xlu1 %121  ;;  %v118_v22 = vpop.permute.xlu0 %117 }
  0xaf   :  { %v124_v23 = vmul.f32 %v118_v22, %v56_v11  ;;  %v125_v26 = vmul.f32 %v122_v21, %v58_v15 }
  0xb0   :  { %110 = vrot.lane.b32.xlu1 %v105_v20, %s391_s2 }
  0xb1   :  { %128 = vrot.lane.b32.xlu0 %v124_v23, %s392_s30 }
  0xb3   :  { %v150_v27 = vpop.permute.xlu1 %149  ;;  %v154_v28 = vpop.permute.xlu0 %153 }
  0xb4   :  { %v156_v29 = vmul.f32 %v150_v27, %v57_v24  ;;  %130 = vrot.lane.b32.xlu1 %v125_v26, %s392_s30  ;;  %v157_v30 = vmul.f32 %v154_v28, %v59_v25 }
  0xb6   :  { %160 = vrot.lane.b32.xlu0 %v156_v29, %s390_s0 }
  0xb8   :  { %v170_v31 = vpop.permute.xlu1 %169  ;;  %162 = vrot.lane.b32.xlu1 %v157_v30, %s390_s0  ;;  %v190_v33 = vpop.permute.xlu0 %189 }
  0xb9   :  { %v176_v32 = vmul.f32 %v170_v31, %v57_v24  ;;  %v196_v35 = vmul.f32 %v190_v33, %v57_v24 }
  0xbc   :  { %v174_v34 = vpop.permute.xlu1 %173  ;;  %180 = vrot.lane.b32.xlu1 %v176_v32, %s391_s2 }
  0xbd   :  { %v177_v36 = vmul.f32 %v174_v34, %v59_v25  ;;  %v70_v41 = vpop.permute.xlu0 %69 }
  0xbe   :  { %v73_v50 = vmul.f32 %v70_v41, %v58_v15 }
  0xbf   :  { %182 = vrot.lane.b32.xlu0 %v177_v36, %s391_s2 }
  0xc0   :  { %200 = vrot.lane.b32.xlu1 %v196_v35, %s392_s30 }
  0xc1   :  { %v194_v37 = vpop.permute.xlu1 %193 }
  0xc2   :  { %v197_v38 = vmul.f32 %v194_v37, %v59_v25  ;;  %v210_v43 = vpop.permute.xlu0 %209 }
  0xc4   :  { %202 = vrot.lane.b32.xlu0 %v197_v38, %s392_s30 }
  0xc6   :  { %v65_v39 = vpop.permute.xlu1 %64 }
  0xc7   :  { %v72_v46 = vmul.f32 %v65_v39, %v56_v11 }
  0xcb   :  { %v138_v40 = vpop.permute.xlu1 %137 }
  0xcc   :  { %v144_v55 = vmul.f32 %v138_v40, %v57_v24 }
  0xcf   :  { %v142_v42 = vpop.permute.xlu1 %141 }
  0xd0   :  { %v145_v60 = vmul.f32 %v142_v42, %v59_v25 }
  0xd4   :  { %v214_v44 = vpop.permute.xlu1 %213 }
 0x11a   :  { %v89_v45 = vpop.permute.xlu0 %88 }
 0x11b   :  { %v94_v49 = vadd.f32 %v89_v45, %v72_v46 }
 0x11e   :  { %v91_v47 = vpop.permute.xlu1 %90  ;;  %v109_v48 = vpop.permute.xlu0 %108 }
 0x11f   :  { %v114_v51 = vadd.f32 %v109_v48, %v94_v49  ;;  %v95_v53 = vadd.f32 %v91_v47, %v73_v50 }
 0x122   :  { %v111_v52 = vpop.permute.xlu1 %110 }
 0x123   :  { %v129_v54 = vpop.permute.xlu0 %128  ;;  %v115_v57 = vadd.f32 %v111_v52, %v95_v53 }
 0x124   :  { %v134_v56 = vadd.f32 %v129_v54, %v114_v51 }
 0x126   :  { %v131_v58 = vpop.permute.xlu1 %130  ;;  %v146_v59 = vadd.f32 %v144_v55, %v134_v56 }
 0x127   :  { %v135_v61 = vadd.f32 %v131_v58, %v115_v57 }
 0x128   :  { %v161_v0 = vpop.permute.xlu0 %160 }
 0x129   :  { %v147_v62 = vadd.f32 %v145_v60, %v135_v61  ;;  %v166_v2 = vadd.f32 %v161_v0, %v146_v59 }
 0x12a   :  { %v163_v63 = vpop.permute.xlu1 %162 }
 0x12b   :  { %v167_v6 = vadd.f32 %v163_v63, %v147_v62 }
 0x12e   :  { %v181_v1 = vpop.permute.xlu1 %180 }
 0x12f   :  { %v186_v3 = vadd.f32 %v181_v1, %v166_v2 }
 0x131   :  { %v183_v4 = vpop.permute.xlu0 %182 }
 0x132   :  { %v201_v5 = vpop.permute.xlu1 %200  ;;  %v187_v8 = vadd.f32 %v183_v4, %v167_v6 }
 0x133   :  { %v206_v7 = vadd.f32 %v201_v5, %v186_v3 }
 0x135   :  { %v216_v9 = vmul.f32 %v210_v43, %v206_v7 }
 0x136   :  { %v203_v10 = vpop.permute.xlu0 %202 }
 0x137   :  { %v207_v11 = vadd.f32 %v203_v10, %v187_v8  ;;  %222 = vrot.lane.b32.xlu1 %v216_v9, %s392_s30 }
 0x139   :  { %v217_v12 = vmul.f32 %v214_v44, %v207_v11 }
 0x13b   :  { %224 = vrot.lane.b32.xlu0 %v217_v12, %s392_s30 }
 0x1a9   :  { %v223_v14 = vpop.permute.xlu1 %222 }
 0x1aa   :  { %v229_v15 = vsel %vm228_vm0, %v218_v13, %v223_v14 }
 0x1ab   :  { %v232_v16 = vsel %vm231_vm1, %v229_v15, 0.0 }
 0x1ac   :  { %234 = vst [vmem:[#allocation8] sm:$0xff] %v232_v16 }
 0x1ad   :  { %v225_v18 = vpop.permute.xlu0 %224 }
 0x1ae   :  { %v230_v19 = vsel %vm228_vm0, %v219_v17, %v225_v18 }
 0x1af   :  { %v233_v20 = vsel %vm231_vm1, %v230_v19, 0.0 }
 0x1b0   :  { %235 = vst [vmem:[#allocation8 + $0x8] sm:$0xff] %v233_v20 }
 0x1b1   :  { %359 = shalt.err (!%p356_p5)
}
 0x1b2   :  { %247 = dma.vmem_to_hbm [thread:$0]  %s242_s5, 256, %s444_s3, [#allocation4], %s375_s15, %s375_s15, %s376_s16  }
 0x1b3   :  { %372 = dma.done.wait [#allocation4], 256  }
 0x1b4   :  { %373 = vsyncadd [#allocation4], 4294967040 }
 0x1b5   :  { %251 = vsyncpa [#allocation3], 1 }
 0x1b6   :  { %252 = vsyncpa [#allocation6], 1 }
 0x1b7   :  { %253 = vsyncpa [#allocation4], 1 }

</bundles_post_ra>
